<compile_context>
chip_gen: v6e
topology: v6e:2x2x1
jax: 0.10.0
libtpu: 0.0.40
codegen_flags: <defaults>
</compile_context>

<pallas_src>
import functools

import jax
import jax.numpy as jnp
from jax.experimental import pallas as pl
from jax.experimental.pallas import tpu as pltpu


def qnet_kernel(x_ref, w1_ref, b1_ref, w2_ref, b2_ref, o_ref):
    # Fused MLP on one batch tile; all operands resident in VMEM.
    h = jnp.dot(x_ref[...], w1_ref[...], preferred_element_type=jnp.float32)
    h = jnp.maximum(h + b1_ref[...], 0.0)                        # bias + ReLU
    y = jnp.dot(h, w2_ref[...], preferred_element_type=jnp.float32)
    o_ref[...] = (y + b2_ref[...]).astype(o_ref.dtype)


def qnet_act_kernel(x_ref, w1_ref, b1_ref, w2_ref, b2_ref, act_ref):
    # Fused MLP + argmax over the (tiny) action axis; only the int32 action
    # leaves the kernel (gameplay path is dispatch-latency bound).
    h = jnp.dot(x_ref[...], w1_ref[...], preferred_element_type=jnp.float32)
    h = jnp.maximum(h + b1_ref[...], 0.0)
    y = jnp.dot(h, w2_ref[...], preferred_element_type=jnp.float32) + b2_ref[...]
    out_size = y.shape[-1]
    ids = jax.lax.broadcasted_iota(jnp.int32, y.shape, dimension=1)
    is_max = y == jnp.max(y, axis=-1, keepdims=True)
    # first index attaining the max (matches jnp.argmax tie-breaking)
    act = jnp.min(jnp.where(is_max, ids, out_size), axis=-1, keepdims=True)
    act_ref[...] = act.astype(act_ref.dtype)


def _full_spec(shape):
    return pl.BlockSpec(shape, lambda: (0,) * len(shape))


def _qnet_pallas_single(x, w1, b1, w2, b2):
    """Whole problem in one grid point (covers all typical snake-agent
    batches). Full-array blocks are exempt from the (8,128) rule."""
    B, in_size = x.shape
    hidden = w1.shape[1]
    out_size = w2.shape[1]
    return pl.pallas_call(
        qnet_kernel,
        out_shape=jax.ShapeDtypeStruct((B, out_size), x.dtype),
        in_specs=[
            _full_spec((B, in_size)),
            _full_spec((in_size, hidden)),
            _full_spec((1, hidden)),
            _full_spec((hidden, out_size)),
            _full_spec((1, out_size)),
        ],
        out_specs=_full_spec((B, out_size)),
    )(x, w1, b1, w2, b2)


def _qnet_pallas_batched(x, w1, b1, w2, b2, block_m):
    """Grid over batch tiles for very large batches. Ragged last block: Pallas
    masks out-of-bounds stores, so no wrapper-side pad/slice is needed (the
    garbage rows of the padded block are never reduced over)."""
    B, in_size = x.shape
    hidden = w1.shape[1]
    out_size = w2.shape[1]
    resident = lambda shape: pl.BlockSpec(shape, lambda i: (0,) * len(shape))
    # Cross-TC (v7x megacore) sharding only pays when compute-bound; at the
    # sizes this net sees it is pure overhead, so keep "arbitrary" unless the
    # batch is genuinely huge.
    dims = ("parallel",) if B >= 16384 else ("arbitrary",)
    return pl.pallas_call(
        qnet_kernel,
        out_shape=jax.ShapeDtypeStruct((B, out_size), x.dtype),
        grid=(pl.cdiv(B, block_m),),
        in_specs=[
            pl.BlockSpec((block_m, in_size), lambda i: (i, 0)),
            resident((in_size, hidden)),
            resident((1, hidden)),
            resident((hidden, out_size)),
            resident((1, out_size)),
        ],
        out_specs=pl.BlockSpec((block_m, out_size), lambda i: (i, 0)),
        compiler_params=pltpu.CompilerParams(dimension_semantics=dims),
    )(x, w1, b1, w2, b2)


@functools.partial(jax.jit, static_argnames=("block_m",))
def linear_qnet_forward(x, params, *, block_m=2048):
    """Forward pass. params = (w1, b1, w2, b2) in kernel layout:
       w1: (in, hidden), b1: (1, hidden), w2: (hidden, out), b2: (1, out).
    block_m capped ~2048: past that the f32 hidden intermediate adds VMEM
    spill traffic without removing any more grid-step overhead."""
    w1, b1, w2, b2 = params
    B = x.shape[0]
    if B <= block_m:
        return _qnet_pallas_single(x, w1, b1, w2, b2)
    return _qnet_pallas_batched(x, w1, b1, w2, b2, block_m)


@jax.jit
def linear_qnet_act(x, params):
    """Gameplay path: fused forward + argmax. Returns int32 actions of shape
    (B, 1); only the action is written back to HBM."""
    w1, b1, w2, b2 = params
    B, in_size = x.shape
    hidden = w1.shape[1]
    out_size = w2.shape[1]
    return pl.pallas_call(
        qnet_act_kernel,
        out_shape=jax.ShapeDtypeStruct((B, 1), jnp.int32),
        in_specs=[
            _full_spec((B, in_size)),
            _full_spec((in_size, hidden)),
            _full_spec((1, hidden)),
            _full_spec((hidden, out_size)),
            _full_spec((1, out_size)),
        ],
        out_specs=_full_spec((B, 1)),
    )(x, w1, b1, w2, b2)


def params_from_torch_layout(w1, b1, w2, b2):
    """One-time conversion from PyTorch nn.Linear layout (out, in) to the
    kernel layout (in, out) + 2-D biases. Done at init, never per call."""
    return (jnp.asarray(w1).T, jnp.asarray(b1).reshape(1, -1),
            jnp.asarray(w2).T, jnp.asarray(b2).reshape(1, -1))


def init_params(key, input_size, hidden_size, output_size):
    """PyTorch-default U(-1/sqrt(fan_in), 1/sqrt(fan_in)) init. Returns
    (kernel-layout params, torch-layout params) — the latter only for the
    reference check below."""
    k1, k2, k3, k4 = jax.random.split(key, 4)
    bound1 = 1.0 / (input_size ** 0.5)
    bound2 = 1.0 / (hidden_size ** 0.5)
    w1 = jax.random.uniform(k1, (hidden_size, input_size), jnp.float32,
                            minval=-bound1, maxval=bound1)
    b1 = jax.random.uniform(k2, (hidden_size,), jnp.float32,
                            minval=-bound1, maxval=bound1)
    w2 = jax.random.uniform(k3, (output_size, hidden_size), jnp.float32,
                            minval=-bound2, maxval=bound2)
    b2 = jax.random.uniform(k4, (output_size,), jnp.float32,
                            minval=-bound2, maxval=bound2)
    torch_layout = (w1, b1, w2, b2)
    return params_from_torch_layout(*torch_layout), torch_layout


def _reference(x, torch_params):
    w1, b1, w2, b2 = torch_params
    return jnp.maximum(x @ w1.T + b1, 0.0) @ w2.T + b2


if __name__ == "__main__":
    input_size, hidden_size, output_size = 11, 32, 3
    key = jax.random.PRNGKey(0)
    kx, kp, kb, kg = jax.random.split(key, 4)
    params, torch_params = init_params(kp, input_size, hidden_size, output_size)

    # 1) Tiny minibatch: single-grid-point path.
    x_small = jax.random.normal(kx, (2, input_size), jnp.float32)
    out_small = jax.block_until_ready(linear_qnet_forward(x_small, params))
    ref_small = _reference(x_small, torch_params)
    assert out_small.shape == (2, output_size)
    assert jnp.allclose(out_small, ref_small, atol=1e-5, rtol=1e-5)

    # 2) Replay-buffer-sized batch (600 rows): with block_m=2048 this is ONE
    #    grid point — no pad, no slice, no multi-step grid overhead.
    x_big = jax.random.normal(kb, (600, input_size), jnp.float32)
    out_big = jax.block_until_ready(linear_qnet_forward(x_big, params))
    ref_big = _reference(x_big, torch_params)
    assert out_big.shape == (600, output_size)
    assert jnp.allclose(out_big, ref_big, atol=1e-4, rtol=1e-4)

    # 3) Exercise the batched ragged-grid path (forced small block_m=256 so the
    #    600-row batch spans 3 grid steps with a partial last block; stores of
    #    the out-of-bounds rows are masked by Pallas — no pad/slice needed).
    out_grid = jax.block_until_ready(
        linear_qnet_forward(x_big, params, block_m=256))
    assert out_grid.shape == (600, output_size)
    assert jnp.allclose(out_grid, ref_big, atol=1e-4, rtol=1e-4)

    # 4) Gameplay path: B=1 fused forward+argmax, int32 action only.
    x_game = jax.random.normal(kg, (1, input_size), jnp.float32)
    act = jax.block_until_ready(linear_qnet_act(x_game, params))
    ref_act = jnp.argmax(_reference(x_game, torch_params), axis=-1)
    assert act.shape == (1, 1)
    assert int(act[0, 0]) == int(ref_act[0])

    # TODO(synk): Linear_QNet.save() (torch.save checkpoint I/O) is host-side
    # file handling with no Pallas equivalent; omitted.

    print("KERNEL_OK")
</pallas_src>

<mosaic_0001>
module attributes {stable_mosaic.version = 11 : i64} {
  func.func @qnet_kernel(%arg0: memref<2x11xf32, #tpu.memory_space<vmem>>, %arg1: memref<11x32xf32, #tpu.memory_space<vmem>>, %arg2: memref<1x32xf32, #tpu.memory_space<vmem>>, %arg3: memref<32x3xf32, #tpu.memory_space<vmem>>, %arg4: memref<1x3xf32, #tpu.memory_space<vmem>>, %arg5: memref<2x3xf32, #tpu.memory_space<vmem>>) attributes {dimension_semantics = [], scalar_prefetch = 0 : i64, scratch_operands = 0 : i64, tpu.core_type = #tpu.core_type<tc>} {
    %c0 = arith.constant 0 : index
    %c0_0 = arith.constant 0 : index
    %0 = vector.load %arg0[%c0, %c0_0] : memref<2x11xf32, #tpu.memory_space<vmem>>, vector<2x11xf32>
    %c0_1 = arith.constant 0 : index
    %c0_2 = arith.constant 0 : index
    %1 = vector.load %arg1[%c0_1, %c0_2] : memref<11x32xf32, #tpu.memory_space<vmem>>, vector<11x32xf32>
    %cst = arith.constant dense<0.000000e+00> : vector<2x32xf32>
    %2 = tpu.matmul %0, %1, %cst {dimension_numbers = #tpu.dot_dimension_numbers<[1], [0], [0], [1], [0, 0, 1, 1], [], []>} : vector<2x11xf32>, vector<11x32xf32>, vector<2x32xf32> -> vector<2x32xf32>
    %c0_3 = arith.constant 0 : index
    %c0_4 = arith.constant 0 : index
    %3 = vector.load %arg2[%c0_3, %c0_4] : memref<1x32xf32, #tpu.memory_space<vmem>>, vector<1x32xf32>
    %4 = vector.broadcast %3 : vector<1x32xf32> to vector<2x32xf32>
    %5 = arith.addf %2, %4 : vector<2x32xf32>
    %cst_5 = arith.constant 0.000000e+00 : f32
    %6 = vector.broadcast %cst_5 : f32 to vector<2x32xf32>
    %7 = arith.maximumf %5, %6 : vector<2x32xf32>
    %c0_6 = arith.constant 0 : index
    %c0_7 = arith.constant 0 : index
    %8 = vector.load %arg3[%c0_6, %c0_7] : memref<32x3xf32, #tpu.memory_space<vmem>>, vector<32x3xf32>
    %cst_8 = arith.constant dense<0.000000e+00> : vector<2x3xf32>
    %9 = tpu.matmul %7, %8, %cst_8 {dimension_numbers = #tpu.dot_dimension_numbers<[1], [0], [0], [1], [0, 0, 1, 1], [], []>} : vector<2x32xf32>, vector<32x3xf32>, vector<2x3xf32> -> vector<2x3xf32>
    %c0_9 = arith.constant 0 : index
    %c0_10 = arith.constant 0 : index
    %10 = vector.load %arg4[%c0_9, %c0_10] : memref<1x3xf32, #tpu.memory_space<vmem>>, vector<1x3xf32>
    %11 = vector.broadcast %10 : vector<1x3xf32> to vector<2x3xf32>
    %12 = arith.addf %9, %11 : vector<2x3xf32>
    %c0_11 = arith.constant 0 : index
    %c0_12 = arith.constant 0 : index
    %13 = vector.load %arg5[%c0_11, %c0_12] : memref<2x3xf32, #tpu.memory_space<vmem>>, vector<2x3xf32>
    tpu.vector_store %arg5[%c0_11, %c0_12], %12 {strides = array<i32>} : memref<2x3xf32, #tpu.memory_space<vmem>>, vector<2x3xf32>,
    return
  }
}

</mosaic_0001>

<bundles_post_ra>
// kernel: linear_qnet_forward.1
= control target key start
LH: loop header
LB: loop body
LE: loop exit
PB: predicated region body
PF: predicated region fallthrough
CT: control target
= control target key end

     0   :  { %vm35_vm0 = vcmask 1042432   ;;  %v267_v1 = vmov 0.0   ;;  %vm268_vm1 = vmmov 0   ;;  %vm31_vm2 = vcmask 89088   ;;  %s330_s0 = inlined_call_operand.vmem [shape: f32[2,11], index: 0, kind: input, shape index: {}]   ;;  %s331_s1 = inlined_call_operand.vmem [shape: f32[11,32], index: 1, kind: input, shape index: {}]   ;;  %s332_s2 = inlined_call_operand.vmem [shape: f32[1,32], index: 2, kind: input, shape index: {}]   ;;  %s333_s3 = inlined_call_operand.vmem [shape: f32[32,3], index: 3, kind: input, shape index: {}]   ;;  %s334_s4 = inlined_call_operand.vmem [shape: f32[1,3], index: 4, kind: input, shape index: {}]   ;;  %s335_s5 = inlined_call_operand.hbm [shape: f32[2,3], index: 5, kind: output, shape index: {}]  }
   0x1   :  { %v23_v0 = vld [vmem:[%s331_s1 + $0x8] sm:$0x7]  ;;  %224 = vmatprep.subr.mxu0 %v267_v1  ;;  %v22_v2 = vld [vmem:[%s331_s1] sm:$0xff]  ;;  %228 = vmatprep.mubr.msk.f32.mxu0 %vm268_vm1, %v267_v1  ;;  %v113_v3 = vld [vmem:[%s333_s3 + $0x18] sm:$0xff] }
   0x2   :  { %225 = vmatpush3.msk.msra.mxu0 %vm35_vm0, %v23_v0  ;;  %v21_v4 = vld [vmem:[%s330_s0] sm:$0x3]  ;;  %231 = vmatprep.subr.mxu1 %v267_v1 }
   0x3   :  { %10 = vsyncpa [#allocation3], 0  ;;  %226 = vmatprep.subr.mxu0 %v267_v1  ;;  %232 = vmatpush3.msra.mxu1 %v113_v3  ;;  %v112_v5 = vld [vmem:[%s333_s3 + $0x10] sm:$0xff]  ;;  %v111_v6 = vld [vmem:[%s333_s3 + $0x8] sm:$0xff]  ;;  %vm121_vm3 = vcmask 261120   ;;  %s269_s9 = smov [#allocation2]  }
   0x4   :  { %227 = vmatpush3.msra.mxu0 %v22_v2  ;;  %233 = vmatprep.subr.mxu1 %v267_v1  ;;  %v110_v7 = vld [vmem:[%s333_s3] sm:$0xff]  ;;  %s203_s10 = sshll.u32 %s269_s9, 4  ;;  %vm195_vm4 = vcmask 17408   ;;  %s204_s10 = int_to_ptr.vmem [resolvable:$true] %s203_s10 }
   0x5   :  { %229 = vmatmul.mubr.msk.f32.vlgmr.msra.gmra.mxu0 %vm31_vm2, %v21_v4  ;;  %239 = vmatprep.mubr.msk.f32.mxu1 %vm268_vm1, %v267_v1  ;;  %v211_v8 = vld [vmem:[%s332_s2] ss:$0 sm:$0xff]  ;;  %s245_s3 = scalar_lea.vmem %s204_s10, 32  ;;  %p250_p1 = scmp.lt.s32.totalorder %s204_s10, %s204_s10 }
   0x6   :  { %234 = vmatpush3.msra.mxu1 %v112_v5  ;;  %v214_v13 = vld [vmem:[%s334_s4] ss:$0 sm:$0xff]  ;;  %p246_p0 = scmp.ne.s32.totalorder %s204_s10, %s245_s3  ;;  %p251_p2 = scmp.lt.s32.totalorder %s245_s3, %s245_s3 }
   0x7   :  { %235 = vmatprep.subr.mxu1 %v267_v1 }
   0x8   :  { %236 = vmatpush3.msra.mxu1 %v111_v6  ;;  %p252_p3 = por %p251_p2, %p250_p1 }
   0x9   :  { %237 = vmatprep.subr.mxu1 %v267_v1 }
   0xa   :  { %238 = vmatpush3.msra.mxu1 %v110_v7  ;;  %p253_p4 = pnand %p252_p3, %p246_p0 }
  0xc5   :  { %v105_v9 = vpop.f32.mrf.mxu0 }
  0xc6   :  { %v106_v10 = vadd.f32 %v211_v8, %v105_v9 }
  0xc7   :  { %v230_v11 = vpop.f32.mrf.mxu0 }
  0xc8   :  { %v109_v12 = vmax.f32 %v106_v10, 0.0 }
  0xca   :  { %240 = vmatmul.mubr.msk.f32.vlgmr.msra.gmra.mxu1 %vm121_vm3, %v109_v12 }
 0x18a   :  { %v191_v14 = vpop.f32.mrf.mxu1 }
 0x18b   :  { %v192_v15 = vadd.f32 %v214_v13, %v191_v14 }
 0x18c   :  { %v241_v16 = vpop.f32.mrf.mxu1 }
 0x18d   :  { %196 = vst.msk [vmem:[#allocation2] sm:$0x3] %vm195_vm4, %v192_v15 }
 0x18e   :  { %256 = shalt.err (!%p253_p4)
}
 0x18f   :  { %206 = dma.vmem_to_hbm [thread:$0]  %s204_s10, 32, %s335_s5, [#allocation3]  }
 0x190   :  { %265 = dma.done.wait [#allocation3], 32  }
 0x191   :  { %266 = vsyncadd [#allocation3], 4294967264 }
 0x192   :  { %210 = vsyncpa [#allocation3], 1 }

</bundles_post_ra>
